<compile_context>
chip_gen: v5e
topology: v5e:2x2
jax: 0.10.0
libtpu: 0.0.40
codegen_flags: <defaults>
</compile_context>

<pallas_src>
import functools

import jax
import jax.numpy as jnp
from jax import lax
from jax.experimental import pallas as pl
from jax.experimental.pallas import tpu as pltpu

LANES = 128


def _default_block_rows():
    # ~8 MiB/input block on 128 MiB-VMEM chips (v5e/v6e), ~4 MiB on 64 MiB
    # chips (v7x), so double-buffered inputs stay comfortably inside VMEM.
    try:
        vmem = pltpu.get_tpu_info().vmem_capacity_bytes
    except Exception:
        vmem = 64 * 1024 * 1024
    return 16384 if vmem >= 96 * 1024 * 1024 else 8192


def _dice_partial_kernel(rows, block_rows, nb, n_inner, total_blocks,
                         p_ref, t_ref, o_pt_ref, o_ps_ref):
    c = pl.program_id(0)            # core split (engages both TCs on v7x)
    j = pl.program_id(1)            # sequential reduction axis

    @pl.when(j == 0)
    def _init():
        o_pt_ref[...] = jnp.zeros_like(o_pt_ref)
        o_ps_ref[...] = jnp.zeros_like(o_ps_ref)

    p = p_ref[...].astype(jnp.float32)
    t = t_ref[...].astype(jnp.float32)

    g = block_rows // 8             # block_rows is always a multiple of 8

    def accumulate(pv, tv):
        # Tree-reduce the block into a single (8, 128) vreg; grouping 8
        # consecutive rows matches the (8, 128) tiling so the reshape is
        # relayout-free.  Outputs act as resident accumulators.
        o_pt_ref[0] += (pv * tv).reshape(g, 8, LANES).sum(axis=0)
        o_ps_ref[0] += (pv + tv).reshape(g, 8, LANES).sum(axis=0)

    n_full = rows // block_rows     # number of fully-valid blocks
    if (n_full * block_rows != rows) or (total_blocks > nb):
        blk = c * n_inner + j

        @pl.when(blk < n_full)
        def _full_block():
            accumulate(p, t)

        @pl.when(blk >= n_full)
        def _masked_block():
            # Covers both the partial last block and the out-of-range block
            # that can appear on one split when nb is odd (its index_map is
            # clamped, so data is valid but must contribute zero).
            row_ids = blk * block_rows + lax.broadcasted_iota(
                jnp.int32, (block_rows, LANES), 0)
            valid = row_ids < rows
            accumulate(jnp.where(valid, p, 0.0), jnp.where(valid, t, 0.0))
    else:
        accumulate(p, t)
    # No finalize needed: the output blocks already hold the partial sums.


def dice_loss(logits, targets, smooth=1e-6, block_rows=None):
    """Pallas TPU implementation of DiceLoss.forward (probs == logits).

    Inputs stream at their native dtype (bf16 probs / int8-bool targets are
    fine at the call site; widening to f32 happens in-kernel).
    """
    assert logits.shape == targets.shape
    n = int(logits.size)
    f32 = jnp.float32

    p_flat = logits.reshape(-1)
    t_flat = targets.reshape(-1)

    # Kernel consumes the (8*128)-aligned prefix; the ragged tail (< 1024
    # elements) is summed here — no whole-array pad pass through HBM.
    rows = (n // (8 * LANES)) * 8
    n_aligned = rows * LANES
    if n_aligned < n:
        p_tail = p_flat[n_aligned:].astype(f32)
        t_tail = t_flat[n_aligned:].astype(f32)
        tail_pt = jnp.sum(p_tail * t_tail)
        tail_ps = jnp.sum(p_tail) + jnp.sum(t_tail)
    else:
        tail_pt = jnp.zeros((), f32)
        tail_ps = jnp.zeros((), f32)

    if rows == 0:
        # Degenerate tiny input: everything fits in the "tail".
        sum_pt, sum_ps = tail_pt, tail_ps
    else:
        p2d = (p_flat[:n_aligned] if n_aligned < n else p_flat).reshape(rows, LANES)
        t2d = (t_flat[:n_aligned] if n_aligned < n else t_flat).reshape(rows, LANES)

        if block_rows is None:
            block_rows = _default_block_rows()
        block_rows = max(8, (min(block_rows, rows) // 8) * 8)

        nb = (rows + block_rows - 1) // block_rows
        # Always engage the 2-way split when there are >= 2 blocks (odd nb
        # included); the extra out-of-range block is clamped + masked.
        nsplit = 2 if nb >= 2 else 1
        n_inner = (nb + nsplit - 1) // nsplit
        total_blocks = nsplit * n_inner

        itemsize = p2d.dtype.itemsize + t2d.dtype.itemsize
        vmem_limit = int(max(32 * 1024 * 1024,
                             2 * block_rows * LANES * itemsize + 4 * 1024 * 1024))

        kernel = functools.partial(_dice_partial_kernel, rows, block_rows,
                                   nb, n_inner, total_blocks)

        def in_map(c, j):
            # Clamp so the possible out-of-range block on one split still
            # DMAs valid data; the kernel masks its contribution to zero.
            return (jnp.minimum(c * n_inner + j, nb - 1), 0)

        out_pt, out_ps = pl.pallas_call(
            kernel,
            out_shape=(
                jax.ShapeDtypeStruct((nsplit, 8, LANES), f32),
                jax.ShapeDtypeStruct((nsplit, 8, LANES), f32),
            ),
            grid_spec=pltpu.PrefetchScalarGridSpec(
                num_scalar_prefetch=0,
                grid=(nsplit, n_inner),
                in_specs=[
                    pl.BlockSpec((block_rows, LANES), in_map),
                    pl.BlockSpec((block_rows, LANES), in_map),
                ],
                out_specs=(
                    pl.BlockSpec((1, 8, LANES), lambda c, j: (c, 0, 0)),
                    pl.BlockSpec((1, 8, LANES), lambda c, j: (c, 0, 0)),
                ),
            ),
            compiler_params=pltpu.CompilerParams(
                # TODO(synk): on v7x, confirm via xprof that the leading
                # "parallel" axis shards across both TensorCores; if not,
                # switch to pltpu.CORE_PARALLEL / pl.core_map.
                dimension_semantics=("parallel", "arbitrary"),
                vmem_limit_bytes=vmem_limit,
            ),
        )(p2d, t2d)

        sum_pt = jnp.sum(out_pt) + tail_pt
        sum_ps = jnp.sum(out_ps) + tail_ps

    dice_coeff = (2.0 * sum_pt + smooth) / (sum_ps + smooth)
    return 1.0 - dice_coeff


def dice_loss_ref(logits, targets, smooth=1e-6):
    probs = logits.astype(jnp.float32)
    targets = targets.astype(jnp.float32)
    intersection = jnp.sum(probs * targets)
    dice_coeff = (2.0 * intersection + smooth) / (
        jnp.sum(probs) + jnp.sum(targets) + smooth)
    return 1.0 - dice_coeff


if __name__ == "__main__":
    key = jax.random.PRNGKey(0)
    k1, k2 = jax.random.split(key)

    # 1) Basic NCHW case: batch=2, channels=4, spatial=16x16 (default block).
    logits = jax.random.uniform(k1, (2, 4, 16, 16), dtype=jnp.float32)
    targets = (jax.random.uniform(k2, (2, 4, 16, 16)) > 0.5).astype(jnp.float32)
    loss = jax.block_until_ready(dice_loss(logits, targets))
    ref = jax.block_until_ready(dice_loss_ref(logits, targets))
    assert jnp.allclose(loss, ref, rtol=1e-5, atol=1e-6), (loss, ref)

    # 2) Multi-block accumulation + even 2-way core split (nb=4).
    l2 = jax.random.uniform(k1, (2, 4, 32, 16), dtype=jnp.float32)
    t2 = (jax.random.uniform(k2, (2, 4, 32, 16)) > 0.5).astype(jnp.float32)
    loss2 = jax.block_until_ready(dice_loss(l2, t2, block_rows=8))
    ref2 = jax.block_until_ready(dice_loss_ref(l2, t2))
    assert jnp.allclose(loss2, ref2, rtol=1e-5, atol=1e-6), (loss2, ref2)

    # 3) Odd block count (nb=3): clamped out-of-range block + in-kernel mask.
    l3 = jax.random.uniform(k1, (2, 4, 24, 16), dtype=jnp.float32)
    t3 = (jax.random.uniform(k2, (2, 4, 24, 16)) > 0.5).astype(jnp.float32)
    loss3 = jax.block_until_ready(dice_loss(l3, t3, block_rows=8))
    ref3 = jax.block_until_ready(dice_loss_ref(l3, t3))
    assert jnp.allclose(loss3, ref3, rtol=1e-5, atol=1e-6), (loss3, ref3)

    # 4) Non-(8*128)-aligned element count: wrapper-side ragged-tail path.
    l4 = jax.random.uniform(k1, (2, 4, 20, 16), dtype=jnp.float32)
    t4 = (jax.random.uniform(k2, (2, 4, 20, 16)) > 0.5).astype(jnp.float32)
    loss4 = jax.block_until_ready(dice_loss(l4, t4, block_rows=8))
    ref4 = jax.block_until_ready(dice_loss_ref(l4, t4))
    assert jnp.allclose(loss4, ref4, rtol=1e-5, atol=1e-6), (loss4, ref4)

    # 5) Narrow-dtype streaming: bf16 probs, f32 targets (kernel widens).
    l5 = jax.random.uniform(k1, (2, 4, 16, 16), dtype=jnp.float32).astype(jnp.bfloat16)
    t5 = (jax.random.uniform(k2, (2, 4, 16, 16)) > 0.5).astype(jnp.float32)
    loss5 = jax.block_until_ready(dice_loss(l5, t5))
    ref5 = jax.block_until_ready(dice_loss_ref(l5, t5))
    assert jnp.allclose(loss5, ref5, rtol=1e-4, atol=1e-5), (loss5, ref5)

    print("KERNEL_OK")
</pallas_src>

<mosaic_0001>
module attributes {stable_mosaic.version = 11 : i64} {
  func.func @_dice_partial_kernel(%arg0: i32, %arg1: i32, %arg2: memref<16x128xf32, #tpu.memory_space<vmem>>, %arg3: memref<16x128xf32, #tpu.memory_space<vmem>>, %arg4: memref<1x8x128xf32, #tpu.memory_space<vmem>>, %arg5: memref<1x8x128xf32, #tpu.memory_space<vmem>>) attributes {dimension_semantics = [#tpu.dimension_semantics<parallel>, #tpu.dimension_semantics<arbitrary>], iteration_bounds = array<i64: 1, 1>, scalar_prefetch = 0 : i64, scratch_operands = 0 : i64, tpu.core_type = #tpu.core_type<tc>, window_params = [{transform_indices = @transform_0, window_bounds = array<i64: 16, 128>}, {transform_indices = @transform_1, window_bounds = array<i64: 16, 128>}, {transform_indices = @transform_2, window_bounds = array<i64: 1, 8, 128>}, {transform_indices = @transform_3, window_bounds = array<i64: 1, 8, 128>}]} {
    %c0_i32 = arith.constant 0 : i32
    %0 = arith.cmpi eq, %arg1, %c0_i32 : i32
    %1 = arith.extui %0 : i1 to i32
    %c0_i32_0 = arith.constant 0 : i32
    %2 = arith.cmpi ne, %1, %c0_i32_0 : i32
    scf.if %2 {
      %cst_17 = arith.constant 0.000000e+00 : f32
      %23 = vector.broadcast %cst_17 : f32 to vector<1x8x128xf32>
      %c0_18 = arith.constant 0 : index
      %c0_19 = arith.constant 0 : index
      %c0_20 = arith.constant 0 : index
      %24 = vector.load %arg4[%c0_18, %c0_19, %c0_20] : memref<1x8x128xf32, #tpu.memory_space<vmem>>, vector<1x8x128xf32>
      tpu.vector_store %arg4[%c0_18, %c0_19, %c0_20], %23 {strides = array<i32>} : memref<1x8x128xf32, #tpu.memory_space<vmem>>, vector<1x8x128xf32>,
      %cst_21 = arith.constant 0.000000e+00 : f32
      %25 = vector.broadcast %cst_21 : f32 to vector<1x8x128xf32>
      %c0_22 = arith.constant 0 : index
      %c0_23 = arith.constant 0 : index
      %c0_24 = arith.constant 0 : index
      %26 = vector.load %arg5[%c0_22, %c0_23, %c0_24] : memref<1x8x128xf32, #tpu.memory_space<vmem>>, vector<1x8x128xf32>
      tpu.vector_store %arg5[%c0_22, %c0_23, %c0_24], %25 {strides = array<i32>} : memref<1x8x128xf32, #tpu.memory_space<vmem>>, vector<1x8x128xf32>,
    } else {
    }
    %c0 = arith.constant 0 : index
    %c0_1 = arith.constant 0 : index
    %3 = vector.load %arg2[%c0, %c0_1] : memref<16x128xf32, #tpu.memory_space<vmem>>, vector<16x128xf32>
    %c0_2 = arith.constant 0 : index
    %c0_3 = arith.constant 0 : index
    %4 = vector.load %arg3[%c0_2, %c0_3] : memref<16x128xf32, #tpu.memory_space<vmem>>, vector<16x128xf32>
    %c0_4 = arith.constant 0 : index
    %c0_5 = arith.constant 0 : index
    %c0_6 = arith.constant 0 : index
    %5 = vector.load %arg4[%c0_4, %c0_5, %c0_6] : memref<1x8x128xf32, #tpu.memory_space<vmem>>, vector<1x8x128xf32>
    %6 = vector.shape_cast %5 : vector<1x8x128xf32> to vector<8x128xf32>
    %7 = arith.mulf %3, %4 : vector<16x128xf32>
    %8 = vector.shape_cast %7 : vector<16x128xf32> to vector<2x8x128xf32>
    %cst = arith.constant dense<0.000000e+00> : vector<8x128xf32>
    %9 = vector.multi_reduction <add>, %8, %cst [0] : vector<2x8x128xf32> to vector<8x128xf32>
    %10 = arith.addf %6, %9 : vector<8x128xf32>
    %c0_7 = arith.constant 0 : index
    %c0_8 = arith.constant 0 : index
    %c0_9 = arith.constant 0 : index
    %11 = vector.load %arg4[%c0_7, %c0_8, %c0_9] : memref<1x8x128xf32, #tpu.memory_space<vmem>>, vector<1x8x128xf32>
    %12 = vector.shape_cast %11 : vector<1x8x128xf32> to vector<8x128xf32>
    %13 = vector.shape_cast %10 : vector<8x128xf32> to vector<1x8x128xf32>
    tpu.vector_store %arg4[%c0_7, %c0_8, %c0_9], %13 {strides = array<i32>} : memref<1x8x128xf32, #tpu.memory_space<vmem>>, vector<1x8x128xf32>,
    %c0_10 = arith.constant 0 : index
    %c0_11 = arith.constant 0 : index
    %c0_12 = arith.constant 0 : index
    %14 = vector.load %arg5[%c0_10, %c0_11, %c0_12] : memref<1x8x128xf32, #tpu.memory_space<vmem>>, vector<1x8x128xf32>
    %15 = vector.shape_cast %14 : vector<1x8x128xf32> to vector<8x128xf32>
    %16 = arith.addf %3, %4 : vector<16x128xf32>
    %17 = vector.shape_cast %16 : vector<16x128xf32> to vector<2x8x128xf32>
    %cst_13 = arith.constant dense<0.000000e+00> : vector<8x128xf32>
    %18 = vector.multi_reduction <add>, %17, %cst_13 [0] : vector<2x8x128xf32> to vector<8x128xf32>
    %19 = arith.addf %15, %18 : vector<8x128xf32>
    %c0_14 = arith.constant 0 : index
    %c0_15 = arith.constant 0 : index
    %c0_16 = arith.constant 0 : index
    %20 = vector.load %arg5[%c0_14, %c0_15, %c0_16] : memref<1x8x128xf32, #tpu.memory_space<vmem>>, vector<1x8x128xf32>
    %21 = vector.shape_cast %20 : vector<1x8x128xf32> to vector<8x128xf32>
    %22 = vector.shape_cast %19 : vector<8x128xf32> to vector<1x8x128xf32>
    tpu.vector_store %arg5[%c0_14, %c0_15, %c0_16], %22 {strides = array<i32>} : memref<1x8x128xf32, #tpu.memory_space<vmem>>, vector<1x8x128xf32>,
    return
  }
  func.func @transform_0(%arg0: i32, %arg1: i32) -> (i32, i32) {
    %c1_i32 = arith.constant 1 : i32
    %0 = arith.muli %arg0, %c1_i32 : i32
    %1 = arith.addi %0, %arg1 : i32
    %c0_i32 = arith.constant 0 : i32
    %2 = arith.minsi %1, %c0_i32 : i32
    %c0_i32_0 = arith.constant 0 : i32
    %c0_i32_1 = arith.constant 0 : i32
    return %2, %c0_i32_0 : i32, i32
  }
  func.func @transform_1(%arg0: i32, %arg1: i32) -> (i32, i32) {
    %c1_i32 = arith.constant 1 : i32
    %0 = arith.muli %arg0, %c1_i32 : i32
    %1 = arith.addi %0, %arg1 : i32
    %c0_i32 = arith.constant 0 : i32
    %2 = arith.minsi %1, %c0_i32 : i32
    %c0_i32_0 = arith.constant 0 : i32
    %c0_i32_1 = arith.constant 0 : i32
    return %2, %c0_i32_0 : i32, i32
  }
  func.func @transform_2(%arg0: i32, %arg1: i32) -> (i32, i32, i32) {
    %c0_i32 = arith.constant 0 : i32
    %c0_i32_0 = arith.constant 0 : i32
    %c0_i32_1 = arith.constant 0 : i32
    return %arg0, %c0_i32, %c0_i32_0 : i32, i32, i32
  }
  func.func @transform_3(%arg0: i32, %arg1: i32) -> (i32, i32, i32) {
    %c0_i32 = arith.constant 0 : i32
    %c0_i32_0 = arith.constant 0 : i32
    %c0_i32_1 = arith.constant 0 : i32
    return %arg0, %c0_i32, %c0_i32_0 : i32, i32, i32
  }
}

</mosaic_0001>

<bundles_post_ra>
// kernel: tpu_custom_call.1
= control target key start
LH: loop header
LB: loop body
LE: loop exit
PB: predicated region body
PF: predicated region fallthrough
CT: control target
= control target key end

     0   :  { %9 = vsyncpa [#allocation3], 0  ;;  %s276_s0 = inlined_call_operand.hbm [shape: f32[16,128], index: 0, kind: input, shape index: {}]   ;;  %s277_s1 = inlined_call_operand.hbm [shape: f32[16,128], index: 1, kind: input, shape index: {}]   ;;  %s278_s2 = inlined_call_operand.hbm [shape: f32[1,8,128], index: 2, kind: output, shape index: {0}]   ;;  %s279_s3 = inlined_call_operand.hbm [shape: f32[1,8,128], index: 3, kind: output, shape index: {1}]  }
   0x1   :  { %10 = vsyncpa [#allocation6], 0 }
   0x2   :  { %11 = vsyncpa [#allocation4], 0 }
   0x3   :  { %12 = vsyncpa [#allocation9], 0  ;;  %s23_s14 = sshll.u32 %s276_s0, 4  ;;  %s238_s15 = smov [#allocation2]   ;;  %s24_s14 = int_to_ptr.hbm [resolvable:$true] %s23_s14 }
   0x4   :  { %s25_s16 = sshll.u32 %s238_s15, 4  ;;  %s42_s19 = sshll.u32 %s277_s1, 4  ;;  %s26_s16 = int_to_ptr.vmem [resolvable:$true] %s25_s16  ;;  %s43_s19 = int_to_ptr.hbm [resolvable:$true] %s42_s19 }
   0x5   :  { %s239_s20 = smov 128   ;;  %s240_s21 = smov 8  }
   0x6   :  { %31 = dma.hbm_to_vmem [thread:$0]  %s24_s14, 256, %s26_s16, [#allocation3], %s239_s20, %s239_s20, %s240_s21  }
   0x7   :  { %s241_s22 = smov [#allocation5]  }
   0x8   :  { %s44_s23 = sshll.u32 %s241_s22, 4  ;;  %s45_s23 = int_to_ptr.vmem [resolvable:$true] %s44_s23 }
   0x9   :  { %50 = dma.hbm_to_vmem [thread:$0]  %s43_s19, 256, %s45_s23, [#allocation6], %s239_s20, %s239_s20, %s240_s21  }
   0xa   :  { %230 = dma.done.wait [#allocation3], 256  }
   0xb   :  { %231 = vsyncadd [#allocation3], 4294967040 }
   0xc   :  { %232 = dma.done.wait [#allocation6], 256  }
   0xd   :  { %233 = vsyncadd [#allocation6], 4294967040  ;;  %v73_v0 = vld [vmem:[#allocation2] sm:$0xff]  ;;  %v74_v1 = vld [vmem:[#allocation2 + $0x8] sm:$0xff]  ;;  %s242_s0 = smov [#allocation7]   ;;  %s96_s26 = sshll.u32 %s278_s2, 4  ;;  %s97_s26 = int_to_ptr.hbm [resolvable:$true] %s96_s26 }
   0xe   :  { %v75_v2 = vld [vmem:[#allocation5] sm:$0xff]  ;;  %v76_v3 = vld [vmem:[#allocation5 + $0x8] sm:$0xff]  ;;  %s94_s1 = sshll.u32 %s242_s0, 4  ;;  %s243_s27 = smov [#allocation8]   ;;  %s95_s1 = int_to_ptr.vmem [resolvable:$true] %s94_s1 }
   0xf   :  { %v78_v4 = vmul.f32 %v75_v2, %v73_v0  ;;  %v84_v5 = vadd.f32 %v75_v2, %v73_v0  ;;  %v79_v6 = vmul.f32 %v76_v3, %v74_v1  ;;  %v85_v7 = vadd.f32 %v76_v3, %v74_v1  ;;  %s105_s28 = sshll.u32 %s243_s27, 4  ;;  %s107_s4 = sshll.u32 %s279_s3, 4  ;;  %s106_s28 = int_to_ptr.vmem [resolvable:$true] %s105_s28  ;;  %s108_s4 = int_to_ptr.hbm [resolvable:$true] %s107_s4 }
  0x11   :  { %v80_v8 = vadd.f32 %v79_v6, %v78_v4  ;;  %v86_v9 = vadd.f32 %v85_v7, %v84_v5 }
  0x13   :  { %82 = vst [vmem:[#allocation7] sm:$0xff] %v80_v8 }
  0x14   :  { %88 = vst [vmem:[#allocation8] sm:$0xff] %v86_v9  ;;  %99 = dma.vmem_to_hbm [thread:$0]  %s95_s1, 128, %s97_s26, [#allocation4]  }
  0x15   :  { %110 = dma.vmem_to_hbm [thread:$0]  %s106_s28, 128, %s108_s4, [#allocation9]  }
  0x16   :  { %234 = dma.done.wait [#allocation4], 128  }
  0x17   :  { %235 = vsyncadd [#allocation4], 4294967168 }
  0x18   :  { %236 = dma.done.wait [#allocation9], 128  }
  0x19   :  { %237 = vsyncadd [#allocation9], 4294967168 }
  0x1a   :  { %119 = vsyncpa [#allocation3], 1 }
  0x1b   :  { %120 = vsyncpa [#allocation6], 1 }
  0x1c   :  { %121 = vsyncpa [#allocation4], 1 }
  0x1d   :  { %122 = vsyncpa [#allocation9], 1 }

</bundles_post_ra>
